<compile_context>
chip_gen: v5e
topology: v5e:2x2
jax: 0.10.0
libtpu: 0.0.40
codegen_flags: <defaults>
</compile_context>

<pallas_src>
import functools

import jax
import jax.numpy as jnp
from jax.experimental import pallas as pl
from jax.experimental.pallas import tpu as pltpu

_F32_INF_BITS = 0x7F800000  # bit pattern of +inf (finite loss => bits < this)
_BISECT_ITERS = 32          # exactly covers the non-negative f32 bit range


def _topk_bce_kernel(logits_ref, targets_ref, out_ref, *, k: int):
    """Per-row BCE-with-logits + exact sum of the top-k values over the last axis."""
    x = logits_ref[...].astype(jnp.float32)   # (R, HW)
    y = targets_ref[...].astype(jnp.float32)  # (R, HW)

    # BCEWithLogitsLoss(reduction='none'), numerically stable, always >= 0:
    #   max(x, 0) - x*y + log1p(exp(-|x|))
    loss = jnp.maximum(x, 0.0) - x * y + jnp.log1p(jnp.exp(-jnp.abs(x)))
    R = loss.shape[0]

    # Non-negative f32 -> int32 bit pattern is monotone in the value, so a
    # fixed binary search over bit space finds the EXACT k-th largest value.
    bits = pltpu.bitcast(loss, jnp.int32)     # (R, HW)

    def count_ge(thr):
        # Lane-parallel VPU count: compare + int32 accumulate across the HW/128
        # lane vregs, then one small cross-lane reduce.  Exact for any HW
        # (int32), no MXU push slot pressure, no bool->bf16 packing.
        return jnp.sum((bits >= thr).astype(jnp.int32), axis=-1, keepdims=True)

    # Invariant: count_ge(lo) >= k, count_ge(hi) < k, cnt_hi == count_ge(hi).
    lo0 = jnp.zeros((R, 1), jnp.int32)
    hi0 = jnp.full((R, 1), _F32_INF_BITS, jnp.int32)
    cnt_hi0 = jnp.zeros((R, 1), jnp.int32)    # count_ge(+inf bits) == 0

    def step(carry):
        lo, hi, cnt_hi = carry
        mid = lo + ((hi - lo) >> 1)           # overflow-safe midpoint
        cnt = count_ge(mid)                   # (R, 1) int32
        ge = cnt >= k
        lo = jnp.where(ge, mid, lo)
        hi = jnp.where(ge, hi, mid)
        cnt_hi = jnp.where(ge, cnt_hi, cnt)   # keep cnt_hi == count_ge(hi)
        return lo, hi, cnt_hi

    def body(_, carry):                       # manual x2 unroll
        return step(step(carry))

    lo, _, cnt_hi = jax.lax.fori_loop(
        0, _BISECT_ITERS // 2, body, (lo0, hi0, cnt_hi0))

    # lo is the bit pattern of the exact k-th largest loss in each row and
    # hi == lo + 1, so cnt_hi == count(bits >= lo+1) == count(loss > tau):
    # the dedicated cnt_gt pass is not needed.
    tau = pltpu.bitcast(lo, jnp.float32)                       # (R, 1)
    sum_gt = jnp.sum(jnp.where(loss > tau, loss, 0.0),
                     axis=-1, keepdims=True)                   # (R, 1), VPU f32
    # Elements strictly above tau are all in the top-k; the remaining
    # (k - cnt_hi) slots are ties equal to tau.
    res = sum_gt + tau * (k - cnt_hi).astype(jnp.float32)      # (R, 1)

    # Lane-dense output: relayout (R, 1) -> (1, R) with a diag-scatter plus a
    # sublane reduction (standard ops only; avoids a sub-tile transpose).
    row_id = jax.lax.broadcasted_iota(jnp.int32, (R, R), 0)
    col_id = jax.lax.broadcasted_iota(jnp.int32, (R, R), 1)
    out_ref[...] = jnp.sum(jnp.where(row_id == col_id, res, 0.0),
                           axis=0, keepdims=True)              # (1, R)


def _generation_params():
    """Returns (tile_vmem_budget_bytes, vmem_limit_bytes, likely_two_tensorcores)."""
    cap = None
    try:
        info = pltpu.get_tpu_info()
        cap = getattr(info, "vmem_capacity_bytes", None)
    except Exception:
        cap = None
    if cap is None:
        cap = 64 * 1024 * 1024                 # conservative: assume v7x-class
    if cap >= 100 * 1024 * 1024:
        # v5e / v6e: 128 MiB physical VMEM, 1 TensorCore per chip.
        return 88 * 1024 * 1024, 104 * 1024 * 1024, False
    # v7x-class: 64 MiB physical VMEM per TC, 2 TensorCores per chip.  Leave
    # headroom below the physical limit for Mosaic's internal scratch.
    return 36 * 1024 * 1024, 52 * 1024 * 1024, True


def _choose_rows(nc: int, hw: int, *, vmem_budget_bytes: int, two_cores: bool) -> int:
    """Pick the row-tile size from a generation-aware VMEM budget."""
    # Per grid step (4 B/elem):
    #   2 inputs x 2 pipeline buffers (f32)            -> 4 * rows*hw*4
    #   loss (f32) + bits (i32), live across all 32 it -> 2 * rows*hw*4
    #   ~2 tiles of compiler temporaries (mask/where)  -> 2 * rows*hw*4
    per_row = 8 * hw * 4
    rows = max(8, min(512, (vmem_budget_bytes // per_row) // 8 * 8))
    nc8 = -(-nc // 8) * 8
    rows = min(rows, nc8)
    if two_cores:
        # Megacore: make sure the "parallel" axis has >= 2 steps so both
        # TensorCores get work...
        while rows > 8 and -(-nc // rows) < 2:
            rows = max(8, ((rows // 2) + 7) // 8 * 8)
        # ...and prefer an even step count so neither TC idles on the tail.
        steps = -(-nc // rows)
        if steps > 2 and steps % 2 == 1 and rows > 8:
            cand = rows - 8
            if -(-nc // cand) % 2 == 0:
                rows = cand
    return rows


def topk_pixel_bce_loss(logits, targets, k_frac=0.1, weight=None, *, rows=None):
    """Forward pass matching TopKPixelCrossEntropyLoss.forward (NCHW inputs)."""
    N, C, H, W = logits.shape
    HW = H * W
    k = int(k_frac * HW)
    assert 1 <= k <= HW, "k_frac * H * W must be in [1, H*W]"

    NC = N * C
    lg = logits.reshape(NC, HW)
    tg = targets.reshape(NC, HW)

    budget, vmem_limit, two_cores = _generation_params()
    if rows is None:
        rows = _choose_rows(NC, HW, vmem_budget_bytes=budget, two_cores=two_cores)
    num_tiles = pl.cdiv(NC, rows)   # ragged tail rows are discarded after the kernel
    # TODO(synk): for H*W too large for even an 8-row tile in VMEM, do NOT
    # stream HW chunks per bisection pass (that would re-read HBM 32x); use a
    # two-pass scheme instead (pass 1: coarse per-row exponent-bucket histogram
    # in one HBM pass; pass 2: refine within the selected bucket).

    out = pl.pallas_call(
        functools.partial(_topk_bce_kernel, k=k),
        out_shape=jax.ShapeDtypeStruct((num_tiles, rows), jnp.float32),
        grid=(num_tiles,),
        in_specs=[
            pl.BlockSpec((rows, HW), lambda i: (i, 0)),
            pl.BlockSpec((rows, HW), lambda i: (i, 0)),
        ],
        out_specs=pl.BlockSpec((1, rows), lambda i: (i, 0)),
        compiler_params=pltpu.CompilerParams(
            dimension_semantics=("parallel",),
            vmem_limit_bytes=vmem_limit,
        ),
    )(lg, tg)

    # Tiny glue reductions (N*C scalars) in plain JAX.
    row_sums = out.reshape(num_tiles * rows)[:NC].reshape(N, C)
    per_channel = jnp.sum(row_sums, axis=0) / (N * k)   # mean over (n, k) -> (C,)
    if weight is not None:
        return jnp.mean(per_channel * jnp.asarray(weight, jnp.float32))
    return jnp.mean(per_channel)


def _reference(logits, targets, k_frac=0.1, weight=None):
    """Pure-JAX reference mirroring the PyTorch module."""
    x = logits.astype(jnp.float32)
    y = targets.astype(jnp.float32)
    loss = jnp.maximum(x, 0.0) - x * y + jnp.log1p(jnp.exp(-jnp.abs(x)))
    N, C, H, W = loss.shape
    loss = loss.reshape(N, C, H * W)
    k = int(k_frac * loss.shape[2])
    topk, _ = jax.lax.top_k(loss, k)                                      # (N, C, k)
    per_channel = jnp.mean(jnp.transpose(topk, (1, 0, 2)), axis=(1, 2))   # (C,)
    if weight is not None:
        return jnp.mean(per_channel * weight)
    return jnp.mean(per_channel)


if __name__ == "__main__":
    key = jax.random.PRNGKey(0)
    k1, k2 = jax.random.split(key)

    N, C, H, W = 2, 4, 16, 16
    logits = jax.random.normal(k1, (N, C, H, W), dtype=jnp.float32)
    targets = (jax.random.uniform(k2, (N, C, H, W)) > 0.5).astype(jnp.float32)

    # Deterministic per-channel weight buffer (shape (C,)), as in __init__.
    weight = jnp.array([1.0, 0.5, 2.0, 1.5], dtype=jnp.float32)

    out = topk_pixel_bce_loss(logits, targets, k_frac=0.1, weight=weight)
    out = jax.block_until_ready(out)
    ref = _reference(logits, targets, k_frac=0.1, weight=weight)
    assert jnp.allclose(out, ref, rtol=1e-5, atol=1e-5), (out, ref)

    # Ragged-tail check: NC % rows != 0 -> last grid step carries padded
    # garbage rows that must be discarded without contaminating valid rows.
    N2, C2 = 3, 4
    lg2 = jax.random.normal(k1, (N2, C2, H, W), dtype=jnp.float32)
    tg2 = (jax.random.uniform(k2, (N2, C2, H, W)) > 0.5).astype(jnp.float32)
    out2 = jax.block_until_ready(topk_pixel_bce_loss(lg2, tg2, k_frac=0.1, rows=8))
    ref2 = _reference(lg2, tg2, k_frac=0.1)
    assert jnp.allclose(out2, ref2, rtol=1e-5, atol=1e-5), (out2, ref2)

    print("KERNEL_OK")
</pallas_src>

<mosaic_0001>
module attributes {stable_mosaic.version = 11 : i64} {
  func.func @_topk_bce_kernel(%arg0: i32, %arg1: memref<8x256xf32, #tpu.memory_space<vmem>>, %arg2: memref<8x256xf32, #tpu.memory_space<vmem>>, %arg3: memref<1x8xf32, #tpu.memory_space<vmem>>) attributes {dimension_semantics = [#tpu.dimension_semantics<parallel>], iteration_bounds = array<i64: 1>, scalar_prefetch = 0 : i64, scratch_operands = 0 : i64, tpu.core_type = #tpu.core_type<tc>, window_params = [{transform_indices = @transform_0, window_bounds = array<i64: 8, 256>}, {transform_indices = @transform_1, window_bounds = array<i64: 8, 256>}, {transform_indices = @transform_2, window_bounds = array<i64: 1, 8>}]} {
    %c0 = arith.constant 0 : index
    %c0_0 = arith.constant 0 : index
    %0 = vector.load %arg1[%c0, %c0_0] : memref<8x256xf32, #tpu.memory_space<vmem>>, vector<8x256xf32>
    %c0_1 = arith.constant 0 : index
    %c0_2 = arith.constant 0 : index
    %1 = vector.load %arg2[%c0_1, %c0_2] : memref<8x256xf32, #tpu.memory_space<vmem>>, vector<8x256xf32>
    %cst = arith.constant 0.000000e+00 : f32
    %2 = vector.broadcast %cst : f32 to vector<8x256xf32>
    %3 = arith.maximumf %0, %2 : vector<8x256xf32>
    %4 = arith.mulf %0, %1 : vector<8x256xf32>
    %5 = arith.subf %3, %4 : vector<8x256xf32>
    %6 = math.absf %0 : vector<8x256xf32>
    %cst_3 = arith.constant 0.000000e+00 : f32
    %7 = vector.broadcast %cst_3 : f32 to vector<8x256xf32>
    %8 = arith.subf %7, %6 : vector<8x256xf32>
    %9 = math.exp %8 : vector<8x256xf32>
    %10 = math.log1p %9 : vector<8x256xf32>
    %11 = arith.addf %5, %10 : vector<8x256xf32>
    %12 = tpu.bitcast %11 : vector<8x256xf32> -> vector<8x256xi32>
    %c0_i32 = arith.constant 0 : i32
    %13 = vector.broadcast %c0_i32 : i32 to vector<8x1xi32>
    %c2139095040_i32 = arith.constant 2139095040 : i32
    %14 = vector.broadcast %c2139095040_i32 : i32 to vector<8x1xi32>
    %c0_i32_4 = arith.constant 0 : i32
    %15 = vector.broadcast %c0_i32_4 : i32 to vector<8x1xi32>
    %c0_i32_5 = arith.constant 0 : i32
    %c16_i32 = arith.constant 16 : i32
    %16 = arith.addi %c0_i32_5, %c16_i32 : i32
    %c1_i32 = arith.constant 1 : i32
    %17:3 = scf.for %arg4 = %c0_i32_5 to %16 step %c1_i32 iter_args(%arg5 = %13, %arg6 = %14, %arg7 = %15) -> (vector<8x1xi32>, vector<8x1xi32>, vector<8x1xi32>)  : i32 {
      %40 = arith.subi %arg6, %arg5 : vector<8x1xi32>
      %c1_i32_12 = arith.constant 1 : i32
      %41 = vector.broadcast %c1_i32_12 : i32 to vector<8x1xi32>
      %42 = arith.shrsi %40, %41 : vector<8x1xi32>
      %43 = arith.addi %arg5, %42 : vector<8x1xi32>
      %44 = vector.broadcast %43 : vector<8x1xi32> to vector<8x256xi32>
      %45 = arith.cmpi sge, %12, %44 : vector<8x256xi32>
      %46 = arith.extui %45 : vector<8x256xi1> to vector<8x256xi32>
      %cst_13 = arith.constant dense<0> : vector<8xi32>
      %47 = vector.multi_reduction <add>, %46, %cst_13 [1] : vector<8x256xi32> to vector<8xi32>
      %48 = vector.shape_cast %47 : vector<8xi32> to vector<8x1xi32>
      %c25_i32_14 = arith.constant 25 : i32
      %49 = vector.broadcast %c25_i32_14 : i32 to vector<8x1xi32>
      %50 = arith.cmpi sge, %48, %49 : vector<8x1xi32>
      %51 = arith.select %50, %43, %arg5 : vector<8x1xi1>, vector<8x1xi32>
      %52 = arith.select %50, %arg6, %43 : vector<8x1xi1>, vector<8x1xi32>
      %53 = arith.select %50, %arg7, %48 : vector<8x1xi1>, vector<8x1xi32>
      %54 = arith.subi %52, %51 : vector<8x1xi32>
      %c1_i32_15 = arith.constant 1 : i32
      %55 = vector.broadcast %c1_i32_15 : i32 to vector<8x1xi32>
      %56 = arith.shrsi %54, %55 : vector<8x1xi32>
      %57 = arith.addi %51, %56 : vector<8x1xi32>
      %58 = vector.broadcast %57 : vector<8x1xi32> to vector<8x256xi32>
      %59 = arith.cmpi sge, %12, %58 : vector<8x256xi32>
      %60 = arith.extui %59 : vector<8x256xi1> to vector<8x256xi32>
      %cst_16 = arith.constant dense<0> : vector<8xi32>
      %61 = vector.multi_reduction <add>, %60, %cst_16 [1] : vector<8x256xi32> to vector<8xi32>
      %62 = vector.shape_cast %61 : vector<8xi32> to vector<8x1xi32>
      %c25_i32_17 = arith.constant 25 : i32
      %63 = vector.broadcast %c25_i32_17 : i32 to vector<8x1xi32>
      %64 = arith.cmpi sge, %62, %63 : vector<8x1xi32>
      %65 = arith.select %64, %57, %51 : vector<8x1xi1>, vector<8x1xi32>
      %66 = arith.select %64, %52, %57 : vector<8x1xi1>, vector<8x1xi32>
      %67 = arith.select %64, %53, %62 : vector<8x1xi1>, vector<8x1xi32>
      scf.yield %65, %66, %67 : vector<8x1xi32>, vector<8x1xi32>, vector<8x1xi32>
    }
    %18 = tpu.bitcast %17#0 : vector<8x1xi32> -> vector<8x1xf32>
    %19 = vector.broadcast %18 : vector<8x1xf32> to vector<8x256xf32>
    %20 = arith.cmpf ogt, %11, %19 : vector<8x256xf32>
    %cst_6 = arith.constant 0.000000e+00 : f32
    %21 = vector.broadcast %cst_6 : f32 to vector<8x256xf32>
    %22 = arith.select %20, %11, %21 : vector<8x256xi1>, vector<8x256xf32>
    %cst_7 = arith.constant dense<0.000000e+00> : vector<8xf32>
    %23 = vector.multi_reduction <add>, %22, %cst_7 [1] : vector<8x256xf32> to vector<8xf32>
    %24 = vector.shape_cast %23 : vector<8xf32> to vector<8x1xf32>
    %c25_i32 = arith.constant 25 : i32
    %25 = vector.broadcast %c25_i32 : i32 to vector<8x1xi32>
    %26 = arith.subi %25, %17#2 : vector<8x1xi32>
    %27 = arith.sitofp %26 : vector<8x1xi32> to vector<8x1xf32>
    %28 = arith.mulf %18, %27 : vector<8x1xf32>
    %29 = arith.addf %24, %28 : vector<8x1xf32>
    %30 = tpu.iota {dimensions = array<i32: 0>} : vector<8x8xi32>
    %31 = tpu.iota {dimensions = array<i32: 1>} : vector<8x8xi32>
    %32 = arith.cmpi eq, %30, %31 : vector<8x8xi32>
    %cst_8 = arith.constant 0.000000e+00 : f32
    %33 = vector.shape_cast %29 : vector<8x1xf32> to vector<8x1xf32>
    %34 = vector.broadcast %33 : vector<8x1xf32> to vector<8x8xf32>
    %35 = vector.broadcast %cst_8 : f32 to vector<8x8xf32>
    %36 = arith.select %32, %34, %35 : vector<8x8xi1>, vector<8x8xf32>
    %cst_9 = arith.constant dense<0.000000e+00> : vector<8xf32>
    %37 = vector.multi_reduction <add>, %36, %cst_9 [0] : vector<8x8xf32> to vector<8xf32>
    %38 = vector.shape_cast %37 : vector<8xf32> to vector<1x8xf32>
    %c0_10 = arith.constant 0 : index
    %c0_11 = arith.constant 0 : index
    %39 = vector.load %arg3[%c0_10, %c0_11] : memref<1x8xf32, #tpu.memory_space<vmem>>, vector<1x8xf32>
    tpu.vector_store %arg3[%c0_10, %c0_11], %38 {strides = array<i32>} : memref<1x8xf32, #tpu.memory_space<vmem>>, vector<1x8xf32>,
    return
  }
  func.func @transform_0(%arg0: i32) -> (i32, i32) {
    %c0_i32 = arith.constant 0 : i32
    %c0_i32_0 = arith.constant 0 : i32
    return %arg0, %c0_i32 : i32, i32
  }
  func.func @transform_1(%arg0: i32) -> (i32, i32) {
    %c0_i32 = arith.constant 0 : i32
    %c0_i32_0 = arith.constant 0 : i32
    return %arg0, %c0_i32 : i32, i32
  }
  func.func @transform_2(%arg0: i32) -> (i32, i32) {
    %c0_i32 = arith.constant 0 : i32
    %c0_i32_0 = arith.constant 0 : i32
    return %arg0, %c0_i32 : i32, i32
  }
}

</mosaic_0001>

<bundles_post_ra>
// kernel: tpu_custom_call.1
= control target key start
LH: loop header
LB: loop body
LE: loop exit
PB: predicated region body
PF: predicated region fallthrough
CT: control target
= control target key end

     0   :  { %7 = vsyncpa [#allocation3], 0  ;;  %s414_s0 = inlined_call_operand.hbm [shape: f32[8,256], index: 0, kind: input, shape index: {}]   ;;  %s415_s1 = inlined_call_operand.hbm [shape: f32[8,256], index: 1, kind: input, shape index: {}]   ;;  %s416_s2 = inlined_call_operand.hbm [shape: f32[1,8], index: 2, kind: output, shape index: {}]  }
   0x1   :  { %8 = vsyncpa [#allocation6], 0 }
   0x2   :  { %9 = vsyncpa [#allocation4], 0  ;;  %s15_s11 = sshll.u32 %s414_s0, 4  ;;  %s351_s12 = smov [#allocation2]   ;;  %s16_s11 = int_to_ptr.hbm [resolvable:$true] %s15_s11 }
   0x3   :  { %s17_s13 = sshll.u32 %s351_s12, 4  ;;  %s26_s16 = sshll.u32 %s415_s1, 4  ;;  %s18_s13 = int_to_ptr.vmem [resolvable:$true] %s17_s13  ;;  %s27_s16 = int_to_ptr.hbm [resolvable:$true] %s26_s16 }
   0x4   :  { %20 = dma.hbm_to_vmem [thread:$0]  %s16_s11, 256, %s18_s13, [#allocation3]  }
   0x5   :  { %s352_s17 = smov [#allocation5]  }
   0x6   :  { %s28_s18 = sshll.u32 %s352_s17, 4  ;;  %s29_s18 = int_to_ptr.vmem [resolvable:$true] %s28_s18 }
   0x7   :  { %31 = dma.hbm_to_vmem [thread:$0]  %s27_s16, 256, %s29_s18, [#allocation6]  }
   0x8   :  { %329 = dma.done.wait [#allocation3], 256  }
   0x9   :  { %330 = vsyncadd [#allocation3], 4294967040 }
   0xa   :  { %331 = dma.done.wait [#allocation6], 256  }
   0xb   :  { %332 = vsyncadd [#allocation6], 4294967040  ;;  %v40_v0 = vld [vmem:[#allocation2] sm:$0xff]  ;;  %v41_v1 = vld [vmem:[#allocation2 + $0x8] sm:$0xff]  ;;  %v380_v36 = vmov 0   ;;  %v382_v37 = vmov 2139095040  }
   0xc   :  { %v50_v2 = vand.u32 2147483647, %v40_v0  ;;  %v51_v3 = vand.u32 2147483647, %v41_v1  ;;  %v42_v12 = vld [vmem:[#allocation5] sm:$0xff]  ;;  %v43_v15 = vld [vmem:[#allocation5 + $0x8] sm:$0xff] }
   0xd   :  { %v44_v17 = vmax.f32 %v40_v0, 0.0  ;;  %v46_v18 = vmul.f32 %v42_v12, %v40_v0  ;;  %v45_v21 = vmax.f32 %v41_v1, 0.0  ;;  %v47_v22 = vmul.f32 %v43_v15, %v41_v1  ;;  %s386_s0 = smov 0  }
   0xe   :  { %v52_v4 = vsub.f32 0.0, %v50_v2  ;;  %v53_v5 = vsub.f32 0.0, %v51_v3  ;;  %v384_v38 = vmov 0  }
   0xf   :  { %v48_v26 = vsub.f32 %v44_v17, %v46_v18  ;;  %v49_v29 = vsub.f32 %v45_v21, %v47_v22 }
  0x10   :  { %v54_v6 = vmul.f32 1.442695, %v52_v4  ;;  %v56_v7 = vmul.f32 1.442695, %v53_v5 }
  0x12   :  { %233 = vpow2.f32 %v54_v6 }
  0x13   :  { %235 = vpow2.f32 %v56_v7 }
  0x18   :  { %v234_v8 = vpop.eup %233 }
  0x19   :  { %v236_v9 = vpop.eup %235  ;;  %v58_v10 = vadd.f32 1.0, %v234_v8  ;;  %v61_v11 = vmul.f32 -0.5, %v234_v8  ;;  %v64_v19 = vand.u32 2147483647, %v234_v8 }
  0x1a   :  { %v67_v13 = vadd.f32 1.0, %v236_v9  ;;  %v70_v14 = vmul.f32 -0.5, %v236_v9  ;;  %v73_v23 = vand.u32 2147483647, %v236_v9 }
  0x1b   :  { %237 = vlog2.f32 %v58_v10  ;;  %v62_v16 = vadd.f32 1.0, %v61_v11  ;;  %vm65_vm0 = vcmp.lt.f32.partialorder %v64_v19, 0.0004427343 }
  0x1c   :  { %239 = vlog2.f32 %v67_v13  ;;  %v71_v20 = vadd.f32 1.0, %v70_v14  ;;  %vm74_vm1 = vcmp.lt.f32.partialorder %v73_v23, 0.0004427343 }
  0x1d   :  { %v63_v24 = vmul.f32 %v234_v8, %v62_v16 }
  0x1e   :  { %v72_v27 = vmul.f32 %v236_v9, %v71_v20 }
  0x21   :  { %v238_v25 = vpop.eup %237 }
  0x22   :  { %v240_v28 = vpop.eup %239  ;;  %v60_v30 = vmul.f32 0.6931472, %v238_v25 }
  0x23   :  { %v69_v31 = vmul.f32 0.6931472, %v240_v28 }
  0x24   :  { %v66_v32 = vsel %vm65_vm0, %v63_v24, %v60_v30 }
  0x25   :  { %v75_v33 = vsel %vm74_vm1, %v72_v27, %v69_v31  ;;  %v376_v34 = vadd.f32 %v66_v32, %v48_v26 }
  0x26   :  { %v378_v35 = vadd.f32 %v75_v33, %v49_v29 }
  0x27 LB: > { %v89_v39 = vsub.s32 %v341_v37, %v345_v38  ;;  %v353_v42 = vmov 0   ;;  %s85_s0 = sadd.s32 1, %s349_s0   ;;  %s349_s0 = sphi %s386_s0, %s85_s0   ;;  %v345_v38 = vphi %v384_v38, %v418_v38   ;;  %v341_v37 = vphi %v382_v37, %v135_v37   ;;  %v337_v36 = vphi %v380_v36, %v417_v36  }
  0x28   : > { %p82_p0 = scmp.ge.s32.totalorder %s85_s0, 16  }
  0x29   : > { %v90_v40 = vshra.s32 %v89_v39, 1  ;;  %v149_v17 = vlaneseq (%p82_p0)  ;;  %vm155_vm11 = vcmask (%p82_p0), 64512   ;;  %s354_s1 = smov (%p82_p0), [#allocation7]   ;;  %s172_s22 = sshll.u32 (%p82_p0), %s416_s2, 4  ;;  %vm163_vm12 = vcmask (%p82_p0), 57344   ;;  %s173_s22 = int_to_ptr.hbm [resolvable:$true] %s172_s22 }
  0x2a   :  { %s170_s19 = sshll.u32 (%p82_p0), %s354_s1, 4  ;;  %s171_s19 = int_to_ptr.vmem [resolvable:$true] %s170_s19 }
  0x2b   : > { %v91_v41 = vadd.s32 %v345_v38, %v90_v40  ;;  %v150_v19 = vshrl.u32 (%p82_p0), %v149_v17, 7  ;;  %v152_v20 = vand.u32 (%p82_p0), 127, %v149_v17 }
  0x2d   : > { %vm92_vm2 = vcmp.ge.s32.totalorder %v376_v34, %v91_v41  ;;  %vm93_vm3 = vcmp.ge.s32.totalorder %v378_v35, %v91_v41  ;;  %vm153_vm10 = vcmp.eq.s32.totalorder (%p82_p0), %v150_v19, %v152_v20 }
  0x2e   : > { %v94_v43 = vsel %vm92_vm2, 1, %v353_v42  ;;  %v95_v44 = vsel %vm93_vm3, 1, %v353_v42 }
  0x2f   : > { %v96_v45 = vadd.s32 %v95_v44, %v94_v43 }
  0x31   : > { %v98_v46 = vshrl.u32 %v96_v45, 16  ;;  %v97_v48 = vand.u32 65535, %v96_v45 }
  0x33   : > { %v100_v47 = vcvt.s32.f32 %v98_v46  ;;  %v99_v49 = vcvt.s32.f32 %v97_v48 }
  0x35   : > { %103 = vadd.xlane.f32.xlu0 %v100_v47 }
  0x3d   : > { %101 = vadd.xlane.f32.xlu0 %v99_v49 }
  0xa8   : > { %v104_v50 = vpop.xlane.xlu0 %103 }
  0xa9   : > { %v106_v51 = vcvt.f32.s32 %v104_v50 }
  0xab   : > { %v107_v53 = vshll.u32 %v106_v51, 16 }
  0xb0   : > { %v102_v52 = vpop.xlane.xlu0 %101 }
  0xb1   : > { %v105_v54 = vcvt.f32.s32 %v102_v52 }
  0xb3   : > { %v108_v55 = vadd.s32 %v107_v53, %v105_v54 }
  0xb5   : > { %vm109_vm4 = vcmp.ge.s32.totalorder %v108_v55, 25 }
  0xb6   : > { %v110_v56 = vsel %vm109_vm4, %v91_v41, %v345_v38  ;;  %v111_v57 = vsel %vm109_vm4, %v341_v37, %v91_v41  ;;  %v112_v58 = vsel %vm109_vm4, %v337_v36, %v108_v55 }
  0xb7   : > { %v113_v59 = vsub.s32 %v111_v57, %v110_v56 }
  0xb9   : > { %v114_v60 = vshra.s32 %v113_v59, 1 }
  0xbb   : > { %v115_v61 = vadd.s32 %v114_v60, %v110_v56 }
  0xbd   : > { %vm116_vm5 = vcmp.ge.s32.totalorder %v376_v34, %v115_v61  ;;  %vm117_vm6 = vcmp.ge.s32.totalorder %v378_v35, %v115_v61 }
  0xbe   : > { %v118_v62 = vsel %vm116_vm5, 1, %v353_v42  ;;  %v119_v63 = vsel %vm117_vm6, 1, %v353_v42 }
  0xbf   : > { %v120_v0 = vadd.s32 %v119_v63, %v118_v62 }
  0xc1   : > { %v122_v1 = vshrl.u32 %v120_v0, 16  ;;  %v121_v3 = vand.u32 65535, %v120_v0 }
  0xc3   : > { %v124_v2 = vcvt.s32.f32 %v122_v1  ;;  %v123_v4 = vcvt.s32.f32 %v121_v3 }
  0xc5   : > { %127 = vadd.xlane.f32.xlu1 %v124_v2 }
  0xcd   : > { %125 = vadd.xlane.f32.xlu1 %v123_v4 }
 0x138   : > { %v128_v5 = vpop.xlane.xlu1 %127 }
 0x139   : > { %v130_v6 = vcvt.f32.s32 %v128_v5 }
 0x13b   : > { %v131_v8 = vshll.u32 %v130_v6, 16 }
 0x140   : > { %v126_v7 = vpop.xlane.xlu1 %125 }
 0x141   : > { %v129_v9 = vcvt.f32.s32 %v126_v7 }
 0x143   : > { %v132_v10 = vadd.s32 %v131_v8, %v129_v9  ;;  %84 = sbr.rel (!%p82_p0) target bundleno = 39 (0x27), region = 43 }
 0x145   : > { %vm133_vm7 = vcmp.ge.s32.totalorder %v132_v10, 25 }
 0x146   : > { %v134_v11 = vsel %vm133_vm7, %v115_v61, %v110_v56   ;;  %v135_v37 = vsel %vm133_vm7, %v111_v57, %v115_v61   ;;  %v136_v12 = vsel %vm133_vm7, %v112_v58, %v132_v10  }
 0x147   : > { %v417_v36 = vmov %v136_v12  ;;  %v418_v38 = vmov %v134_v11  ;;  %vm138_vm8 = vcmp.gt.f32.partialorder (%p82_p0), %v376_v34, %v134_v11  ;;  %vm139_vm9 = vcmp.gt.f32.partialorder (%p82_p0), %v378_v35, %v134_v11 }
 0x148   :  { %v140_v13 = vsel %vm138_vm8, %v376_v34, 0.0  ;;  %v141_v14 = vsel %vm139_vm9, %v378_v35, 0.0  ;;  %v145_v16 = vsub.s32 25, %v136_v12 }
 0x149   :  { %v142_v15 = vadd.f32 %v141_v14, %v140_v13 }
 0x14a   :  { %v146_v18 = vcvt.s32.f32 %v145_v16 }
 0x14b   :  { %143 = vadd.xlane.f32.xlu0 %v142_v15 }
 0x14c   :  { %v147_v21 = vmul.f32 %v146_v18, %v134_v11 }
 0x1be   :  { %v144_v22 = vpop.xlane.xlu0 %143 }
 0x1bf   :  { %v148_v23 = vadd.f32 %v147_v21, %v144_v22 }
 0x1c1   :  { %v154_v24 = vsel %vm153_vm10, %v148_v23, 0.0 }
 0x1c2   :  { %v156_v25 = vsel %vm155_vm11, %v154_v24, 0.0 }
 0x1c3   :  { %v157_v26 = vrot.slane %v156_v25, 4 }
 0x1c5   :  { %v158_v27 = vadd.f32 %v157_v26, %v156_v25 }
 0x1c7   :  { %v159_v28 = vrot.slane %v158_v27, 2 }
 0x1c9   :  { %v160_v29 = vadd.f32 %v159_v28, %v158_v27 }
 0x1cb   :  { %v161_v30 = vrot.slane %v160_v29, 1 }
 0x1cd   :  { %v162_v31 = vadd.f32 %v161_v30, %v160_v29 }
 0x1cf   :  { %164 = vst.msk [vmem:[#allocation7] sm:$0x1] %vm163_vm12, %v162_v31 }
 0x1d0   :  { %175 = dma.vmem_to_hbm [thread:$0]  %s171_s19, 16, %s173_s22, [#allocation4]  }
 0x1d1   :  { %333 = dma.done.wait [#allocation4], 16  }
 0x1d2   :  { %334 = vsyncadd [#allocation4], 4294967280 }
 0x1d3   :  { %180 = vsyncpa [#allocation3], 1 }
 0x1d4   :  { %181 = vsyncpa [#allocation6], 1 }
 0x1d5   :  { %182 = vsyncpa [#allocation4], 1 }

</bundles_post_ra>
